<compile_context>
chip_gen: v5e
topology: v5e:2x2
jax: 0.10.0
libtpu: 0.0.40
codegen_flags: <defaults>
</compile_context>

<pallas_src>
import math

import jax
import jax.numpy as jnp
from jax.experimental import pallas as pl
from jax.experimental.pallas import tpu as pltpu

_LANES = 128


def _cdiv(a, b):
    return (a + b - 1) // b


def _round_up(x, m):
    return ((x + m - 1) // m) * m


def _sublane_multiple(itemsize):
    # Second-minor tiling multiple: 8 for 32-bit, 16 for 16-bit, 32 for 8-bit.
    return max(8, 32 // itemsize)


def _vmem_budget():
    """(working-set budget, scoped-vmem limit) in bytes, generation-aware."""
    try:
        cap = int(pltpu.get_tpu_info().vmem_capacity_bytes)
    except Exception:
        cap = 64 << 20  # be conservative: v7x per-TensorCore VMEM
    budget = max(4 << 20, cap // 8)            # all live blocks, double-buffered
    limit = int(min(max(cap // 4, 32 << 20), 64 << 20))
    return budget, limit


def _interleave_factor(c, hw):
    """K such that the output can be stored lane-dense as (N, HW/K, K*C)."""
    if c >= _LANES:
        return 1                        # already >= 1 vreg of lanes per position
    k = _LANES // math.gcd(c, _LANES)   # smallest K with (K*C) % 128 == 0
    if hw % k:
        return 1                        # output reshape would not be free
    return k


def _pick_block_rows(total_rows, batch, live_bytes_per_row, budget_bytes, align):
    """Output rows per block: an align-multiple (or the full extent), sized so
    the padded, double-buffered in+out blocks fit the budget, and shrunk when
    the grid would otherwise be too shallow to pipeline / shard on v7x."""
    rows = budget_bytes // max(1, live_bytes_per_row)
    if rows >= total_rows or total_rows <= align:
        rows = total_rows
    else:
        rows = max(align, (rows // align) * align)
    for _ in range(8):
        if rows <= align or batch * _cdiv(total_rows, rows) >= 8:
            break
        rows = max(align, ((rows // 2) // align) * align)
    return rows


def _relayout_kernel(x_ref, o_ref):
    # x_ref: (C, T) slab of one image (T spatial positions; C strided HBM rows).
    # o_ref: (T//K, K*C) channels-last slab (contiguous in HBM).
    # Row-major (T, C) == row-major (T//K, K*C), so this is a 2-D transpose
    # (XLU) plus a pure row-major in-register reshape that makes the stores
    # lane-dense.  For K == 1 the reshape is a no-op ((C, T) -> (T, C) only).
    o_ref[...] = jnp.transpose(x_ref[...]).reshape(o_ref.shape)


def _to_channels_last_impl(x, k):
    n, c, h, w = x.shape
    hw = h * w
    itemsize = jnp.dtype(x.dtype).itemsize
    kc = k * c
    out_rows = hw // k                     # rows of the (N, HW/K, K*C) output
    budget, vmem_limit = _vmem_budget()

    # Padded VMEM bytes per output row, double-buffered input + output blocks.
    in_row = _round_up(c, _sublane_multiple(itemsize)) * k * itemsize
    out_row = _round_up(kc, _LANES) * itemsize
    live_per_row = 2 * (in_row + out_row)
    align = max(8, _LANES // k)            # keeps the input block's minor dim 128-aligned
    tg = _pick_block_rows(out_rows, n, live_per_row, budget, align)
    t = tg * k                             # spatial positions per block

    x_flat = x.reshape(n, c, hw)           # free metadata reshape of NCHW
    grid = (n, _cdiv(out_rows, tg))

    out_flat = pl.pallas_call(
        _relayout_kernel,
        out_shape=jax.ShapeDtypeStruct((n, out_rows, kc), x.dtype),
        grid_spec=pltpu.PrefetchScalarGridSpec(
            num_scalar_prefetch=0,
            grid=grid,
            in_specs=[
                # (C, T): C is the full extent, T is a multiple of 128 (or the
                # full extent); HBM side = C strided rows of T*itemsize each.
                pl.BlockSpec((pl.Squeezed(), c, t), lambda i, j: (i, 0, j)),
            ],
            # (TG, K*C): lane-dense, contiguous in HBM; the ragged last block
            # (cdiv grid) is masked by Pallas on store.
            out_specs=pl.BlockSpec((pl.Squeezed(), tg, kc), lambda i, j: (i, j, 0)),
        ),
        compiler_params=pltpu.CompilerParams(
            dimension_semantics=("parallel", "parallel"),
            vmem_limit_bytes=vmem_limit,
        ),
        cost_estimate=pl.CostEstimate(
            flops=0,
            transcendentals=0,
            bytes_accessed=2 * x.size * itemsize,
        ),
    )(x_flat)

    # Free metadata reshape: row-major (N, HW/K, K*C) == (N, H, W, C).
    return out_flat.reshape(n, h, w, c)


def to_channels_last(x):
    """NCHW -> NHWC, equivalent to torch `x.permute(0, 2, 3, 1)`."""
    _, c, h, w = x.shape
    k = _interleave_factor(c, h * w)
    tracer_cls = getattr(jax.core, "Tracer", ())
    if k > 1 and not isinstance(x, tracer_cls):
        try:
            return _to_channels_last_impl(x, k)
        except Exception:
            # This Mosaic version cannot lower the in-register repack for this
            # (dtype, C) combination -> use the plain (T, C) store layout.
            pass
    return _to_channels_last_impl(x, 1)


if __name__ == "__main__":
    key = jax.random.PRNGKey(0)
    x = jax.random.normal(key, (2, 4, 16, 16), dtype=jnp.float32)  # NCHW

    out = to_channels_last(x)
    out = jax.block_until_ready(out)

    ref = jnp.transpose(x, (0, 2, 3, 1))
    assert out.shape == (2, 16, 16, 4), out.shape
    assert out.dtype == x.dtype
    assert jnp.array_equal(out, ref), "mismatch vs reference permute"

    print("KERNEL_OK")
</pallas_src>

<mosaic_0001>
module attributes {stable_mosaic.version = 11 : i64} {
  func.func @_relayout_kernel(%arg0: i32, %arg1: i32, %arg2: memref<1x4x256xf32, #tpu.memory_space<vmem>>, %arg3: memref<1x8x128xf32, #tpu.memory_space<vmem>>) attributes {dimension_semantics = [#tpu.dimension_semantics<parallel>, #tpu.dimension_semantics<parallel>], iteration_bounds = array<i64: 2, 1>, scalar_prefetch = 0 : i64, scratch_operands = 0 : i64, tpu.core_type = #tpu.core_type<tc>, window_params = [{transform_indices = @transform_0, window_bounds = array<i64: 1, 4, 256>}, {transform_indices = @transform_1, window_bounds = array<i64: 1, 8, 128>}]} {
    %c0 = arith.constant 0 : index
    %c0_0 = arith.constant 0 : index
    %c0_1 = arith.constant 0 : index
    %0 = vector.load %arg2[%c0, %c0_0, %c0_1] : memref<1x4x256xf32, #tpu.memory_space<vmem>>, vector<1x4x256xf32>
    %1 = vector.shape_cast %0 : vector<1x4x256xf32> to vector<4x256xf32>
    %2 = tpu.transpose %1, [1, 0] : vector<4x256xf32> -> vector<256x4xf32>
    %3 = vector.shape_cast %2 : vector<256x4xf32> to vector<8x128xf32>
    %c0_2 = arith.constant 0 : index
    %c0_3 = arith.constant 0 : index
    %c0_4 = arith.constant 0 : index
    %4 = vector.load %arg3[%c0_2, %c0_3, %c0_4] : memref<1x8x128xf32, #tpu.memory_space<vmem>>, vector<1x8x128xf32>
    %5 = vector.shape_cast %4 : vector<1x8x128xf32> to vector<8x128xf32>
    %6 = vector.shape_cast %3 : vector<8x128xf32> to vector<1x8x128xf32>
    tpu.vector_store %arg3[%c0_2, %c0_3, %c0_4], %6 {strides = array<i32>} : memref<1x8x128xf32, #tpu.memory_space<vmem>>, vector<1x8x128xf32>,
    return
  }
  func.func @transform_0(%arg0: i32, %arg1: i32) -> (i32, i32, i32) {
    %c0_i32 = arith.constant 0 : i32
    %c0_i32_0 = arith.constant 0 : i32
    return %arg0, %c0_i32, %arg1 : i32, i32, i32
  }
  func.func @transform_1(%arg0: i32, %arg1: i32) -> (i32, i32, i32) {
    %c0_i32 = arith.constant 0 : i32
    %c0_i32_0 = arith.constant 0 : i32
    return %arg0, %arg1, %c0_i32 : i32, i32, i32
  }
}

module attributes {stable_mosaic.version = 11 : i64} {
  func.func @_relayout_kernel(%arg0: i32, %arg1: i32, %arg2: memref<1x4x128xf32, #tpu.memory_space<vmem>>, %arg3: memref<1x128x4xf32, #tpu.memory_space<vmem>>) attributes {dimension_semantics = [#tpu.dimension_semantics<parallel>, #tpu.dimension_semantics<parallel>], iteration_bounds = array<i64: 2, 2>, scalar_prefetch = 0 : i64, scratch_operands = 0 : i64, tpu.core_type = #tpu.core_type<tc>, window_params = [{transform_indices = @transform_0, window_bounds = array<i64: 1, 4, 128>}, {transform_indices = @transform_1, window_bounds = array<i64: 1, 128, 4>}]} {
    %c0 = arith.constant 0 : index
    %c0_0 = arith.constant 0 : index
    %c0_1 = arith.constant 0 : index
    %0 = vector.load %arg2[%c0, %c0_0, %c0_1] : memref<1x4x128xf32, #tpu.memory_space<vmem>>, vector<1x4x128xf32>
    %1 = vector.shape_cast %0 : vector<1x4x128xf32> to vector<4x128xf32>
    %2 = tpu.transpose %1, [1, 0] : vector<4x128xf32> -> vector<128x4xf32>
    %c0_2 = arith.constant 0 : index
    %c0_3 = arith.constant 0 : index
    %c0_4 = arith.constant 0 : index
    %3 = vector.load %arg3[%c0_2, %c0_3, %c0_4] : memref<1x128x4xf32, #tpu.memory_space<vmem>>, vector<1x128x4xf32>
    %4 = vector.shape_cast %3 : vector<1x128x4xf32> to vector<128x4xf32>
    %5 = vector.shape_cast %2 : vector<128x4xf32> to vector<1x128x4xf32>
    tpu.vector_store %arg3[%c0_2, %c0_3, %c0_4], %5 {strides = array<i32>} : memref<1x128x4xf32, #tpu.memory_space<vmem>>, vector<1x128x4xf32>,
    return
  }
  func.func @transform_0(%arg0: i32, %arg1: i32) -> (i32, i32, i32) {
    %c0_i32 = arith.constant 0 : i32
    %c0_i32_0 = arith.constant 0 : i32
    return %arg0, %c0_i32, %arg1 : i32, i32, i32
  }
  func.func @transform_1(%arg0: i32, %arg1: i32) -> (i32, i32, i32) {
    %c0_i32 = arith.constant 0 : i32
    %c0_i32_0 = arith.constant 0 : i32
    return %arg0, %arg1, %c0_i32 : i32, i32, i32
  }
}

</mosaic_0001>

<bundles_post_ra>
// kernel: tpu_custom_call.1
= control target key start
LH: loop header
LB: loop body
LE: loop exit
PB: predicated region body
PF: predicated region fallthrough
CT: control target
= control target key end

     0   :  { %6 = vsyncpa [#allocation3], 0  ;;  %s652_s0 = inlined_call_operand.hbm [shape: f32[2,4,256], index: 0, kind: input, shape index: {}]   ;;  %s653_s1 = inlined_call_operand.vmem [shape: f32[2,256,4], index: 1, kind: output, shape index: {}]  }
   0x1   :  { %8 = vsyncpa [#allocation3 + $0x1], 0  ;;  %s504_s6 = smov 0   ;;  %s506_s7 = smov 0  }
   0x2   :  { %s508_s8 = smov 0   ;;  %s510_s9 = smov 0  }
   0x3   :  { %s512_s10 = smov 0   ;;  %s514_s11 = smov 0  }
   0x4   :  { %s516_s12 = smov 0   ;;  %s518_s13 = smov 0  }
   0x5 LB: > { %s310_s14 = sadd.s32 4294967295, %s492_s13   ;;  %s23_s15 = sadd.s32 1, %s484_s11  ;;  %s492_s13 = sphi %s518_s13, %s14_s13   ;;  %s488_s12 = sphi %s516_s12, %s662_s12   ;;  %s484_s11 = sphi %s514_s11, %s661_s11   ;;  %s480_s10 = sphi %s512_s10, %s660_s10   ;;  %s476_s9 = sphi %s510_s9, %s659_s9   ;;  %s472_s8 = sphi %s508_s8, %s658_s8   ;;  %s468_s7 = sphi %s506_s7, %s657_s7   ;;  %s464_s6 = sphi %s504_s6, %s656_s6  }
   0x6   : > { %p24_p0 = scmp.ge.s32.totalorder %s23_s15, 2  ;;  %s26_s16 = sadd.s32 1, %s488_s12 }
   0x7   : > { %s35_s17 = sadd.s32 1, %s472_s8  ;;  %p42_p1 = scmp.ne.s32.totalorder %s472_s8, %s468_s7 }
   0x8   : > { %s664_s15 = smov (%p24_p0, %s23_s15), 0  ;;  %s666_s16 = smov (!%p24_p0, %s26_s16), %s488_s12 }
   0x9   : > { %s31_s18 = ssub.s32 %s484_s11, %s664_s15  ;;  %p43_p2 = scmp.eq.s32.totalorder %s492_s13, 0 }
   0xa   : > { %p28_p3 = scmp.ge.s32.totalorder %s666_s16, 2  ;;  %p48_p4 = scmp.ne.s32.totalorder %s468_s7, %s464_s6 }
   0xb   : > { %p555_p5 = por %p43_p2, %p42_p1  ;;  %p49_p6 = scmp.eq.s32.totalorder %s310_s14, 0 }
   0xc   : > { %s668_s16 = smov (%p28_p3, %s666_s16), 0  ;;  %p330_p8 = scmp.lt.s32.totalorder %s492_s13, 4 }
   0xd   : > { %p561_p7 = por %p49_p6, %p48_p4  ;;  %s30_s21 = ssub.s32 %s488_s12, %s668_s16 }
   0xe   : > { %s32_s22 = sor.u32 %s31_s18, %s30_s21  ;;  %s100_s23 = sand.u32 1, %s472_s8  }
   0xf   : > { %p33_p9 = scmp.eq.s32.totalorder %s32_s22, 0  ;;  %s314_s24 = sshll.u32 %s100_s23, 2 }
  0x10   : > { %s315_s25 = sshll.u32 %s488_s12, 1  ;;  %s104_s29 = scalar_lea.vmem [#allocation2], %s314_s24 }
  0x11   : > { %s571_s26 = scalar_select %p33_p9, %s472_s8, %s35_s17  }
  0x12   : > { %s108_s27 = sadd.s32 %s484_s11, %s315_s25  ;;  %s114_s30 = sshll.u32 %s104_s29, 4  ;;  %s115_s30 = int_to_ptr.vmem [resolvable:$true] %s114_s30 }
  0x13   : > { %s316_s28 = sshll.u32 %s108_s27, 2  ;;  %p327_p10 = pnand %p330_p8, %p555_p5 }
  0x14   : > { %s110_s4 = scalar_lea.hbm %s652_s0, %s316_s28  ;;  %p317_p11 = scmp.ge.s32.totalorder %s492_s13, 1 }
  0x15   : > { %s112_s5 = sshll.u32 %s110_s4, 4  ;;  %p119_p12 = scmp.lt.s32.totalorder %s492_s13, 5  ;;  %s113_s5 = int_to_ptr.hbm [resolvable:$true] %s112_s5 }
  0x16   : > { %s101_s6 = scalar_lea.sflag [#allocation3], %s100_s23 }
  0x17   : > { %329 = dma.hbm_to_vmem [thread:$0]  (!%p327_p10), %s113_s5, 64, %s115_s30, %s101_s6  }
  0x18   : > { %p120_p13 = pnand %p317_p11, %p119_p12 }
  0x19   : > { %s125_s14 = sand.u32 (!%p120_p13), 1, %s468_s7  }
  0x1a   : > { %123 = sbr.rel (%p120_p13) target bundleno = 319 (0x13f), region = 24  ;;  %s318_s17 = sshll.u32 (!%p120_p13), %s125_s14, 2 }
  0x1b   : > { %s126_s18 = scalar_lea.sflag (!%p120_p13), [#allocation3], %s125_s14  ;;  %s129_s21 = scalar_lea.vmem (!%p120_p13), [#allocation2], %s318_s17 }
  0x1f   : > { %459 = dma.done.wait (%p561_p7), %s126_s18, 64  }
  0x20   : > { %461 = vsyncadd (%p561_p7), %s126_s18, 4294967232  ;;  %v163_v0 = vld [vmem:[%s129_s21] sm:$0xf]  ;;  %s319_s19 = sshll.u32 %s476_s9, 4  ;;  %p154_p0 = scmp.lt.s32.totalorder %s480_s10, 1  ;;  %vm196_vm0 = vcmask 31744  }
  0x21   : > { %164 = vxpose.xlu0.b32.start.end [1/1] (short) %v163_v0, 128  ;;  %p156_p1 = scmp.lt.s32.totalorder %s319_s19, 31 }
  0x22   : > { %s670_s10 = smov (!%p154_p0, %s480_s10), 1 }
  0x23   : > { %s672_s19 = smov (!%p156_p1, %s319_s19), 31  ;;  %s320_s22 = sshll.u32 %s670_s10, 5 }
  0x24   : > { %s159_s23 = sadd.s32 %s320_s22, %s672_s19 }
  0x25   : > { %s321_s24 = sshll.u32 %s159_s23, 3 }
  0x26   : > { %s594_s28 = scalar_lea.vmem %s653_s1, %s321_s24 }
  0xc5   : > { %v180_v1 = vpop.trf.xlu0 }
  0xc6   : > { %197 = vst.msk [vmem:[%s594_s28] sm:$0xff] %vm196_vm0, %v180_v1 }
  0xcd   : > { %v181_v2 = vpop.trf.xlu0 }
  0xce   : > { %198 = vst.msk [vmem:[%s594_s28 + $0x8] sm:$0xff] %vm196_vm0, %v181_v2 }
  0xd5   : > { %v182_v3 = vpop.trf.xlu0 }
  0xd6   : > { %199 = vst.msk [vmem:[%s594_s28 + $0x10] sm:$0xff] %vm196_vm0, %v182_v3 }
  0xdd   : > { %v183_v4 = vpop.trf.xlu0 }
  0xde   : > { %200 = vst.msk [vmem:[%s594_s28 + $0x18] sm:$0xff] %vm196_vm0, %v183_v4 }
  0xe5   : > { %v184_v5 = vpop.trf.xlu0 }
  0xe6   : > { %201 = vst.msk [vmem:[%s594_s28 + $0x20] sm:$0xff] %vm196_vm0, %v184_v5 }
  0xed   : > { %v185_v6 = vpop.trf.xlu0 }
  0xee   : > { %202 = vst.msk [vmem:[%s594_s28 + $0x28] sm:$0xff] %vm196_vm0, %v185_v6 }
  0xf5   : > { %v186_v7 = vpop.trf.xlu0 }
  0xf6   : > { %203 = vst.msk [vmem:[%s594_s28 + $0x30] sm:$0xff] %vm196_vm0, %v186_v7 }
  0xfd   : > { %v187_v8 = vpop.trf.xlu0 }
  0xfe   : > { %204 = vst.msk [vmem:[%s594_s28 + $0x38] sm:$0xff] %vm196_vm0, %v187_v8 }
 0x105   : > { %v188_v9 = vpop.trf.xlu0 }
 0x106   : > { %205 = vst.msk [vmem:[%s594_s28 + $0x40] sm:$0xff] %vm196_vm0, %v188_v9 }
 0x10d   : > { %v189_v10 = vpop.trf.xlu0 }
 0x10e   : > { %206 = vst.msk [vmem:[%s594_s28 + $0x48] sm:$0xff] %vm196_vm0, %v189_v10 }
 0x115   : > { %v190_v11 = vpop.trf.xlu0 }
 0x116   : > { %207 = vst.msk [vmem:[%s594_s28 + $0x50] sm:$0xff] %vm196_vm0, %v190_v11 }
 0x11d   : > { %v191_v12 = vpop.trf.xlu0 }
 0x11e   : > { %208 = vst.msk [vmem:[%s594_s28 + $0x58] sm:$0xff] %vm196_vm0, %v191_v12 }
 0x125   : > { %v192_v13 = vpop.trf.xlu0 }
 0x126   : > { %209 = vst.msk [vmem:[%s594_s28 + $0x60] sm:$0xff] %vm196_vm0, %v192_v13 }
 0x12d   : > { %v193_v14 = vpop.trf.xlu0 }
 0x12e   : > { %210 = vst.msk [vmem:[%s594_s28 + $0x68] sm:$0xff] %vm196_vm0, %v193_v14 }
 0x135   : > { %v194_v15 = vpop.trf.xlu0 }
 0x136   : > { %211 = vst.msk [vmem:[%s594_s28 + $0x70] sm:$0xff] %vm196_vm0, %v194_v15 }
 0x13d   : > { %v195_v16 = vpop.trf.xlu0 }
 0x13e   : > { %212 = vst.msk [vmem:[%s594_s28 + $0x78] sm:$0xff] %vm196_vm0, %v195_v16 }
 0x13f PF: > { %s14_s13 = sadd.s32 1, %s492_s13   ;;  %s656_s6 = smov %s468_s7 }
 0x140   : > { %p11_p2 = scmp.ge.s32.totalorder %s14_s13, 6   ;;  %s657_s7 = smov %s472_s8 }
 0x141   : > { %s658_s8 = smov %s571_s26  ;;  %s659_s9 = smov %s484_s11 }
 0x142   : > { %s660_s10 = smov %s488_s12  ;;  %s661_s11 = smov %s664_s15 }
 0x143   : > { %s662_s12 = smov %s668_s16  ;;  %13 = sbr.rel (!%p11_p2) target bundleno = 5 (0x5), region = 64 }
 0x148   :  { %243 = vsyncpa [#allocation3], 1 }
 0x149   :  { %245 = vsyncpa [#allocation3 + $0x1], 1 }

</bundles_post_ra>
